<compile_context>
chip_gen: v7x
topology: tpu7x:2x2x1
jax: 0.10.0
libtpu: 0.0.40
codegen_flags: <defaults>
</compile_context>

<pallas_src>
import functools
import math

import jax
import jax.numpy as jnp
from jax import lax
from jax.experimental import pallas as pl
from jax.experimental.pallas import tpu as pltpu


# ----------------------------- helpers traced inside kernels -----------------------------

def _layer_norm(x, g, b, eps=1e-12):
    mu = jnp.mean(x, axis=-1, keepdims=True)
    var = jnp.mean((x - mu) ** 2, axis=-1, keepdims=True)
    return (x - mu) * lax.rsqrt(var + eps) * g + b


def _gelu_new(x):
    # "gelu_new" used by albert-base-v2 (tanh approximation)
    return 0.5 * x * (1.0 + jnp.tanh(0.7978845608028654 * (x + 0.044715 * x * x * x)))


# ----------------------------- Pallas kernels -----------------------------

def embed_map_kernel(emb_ref, g_ref, b_ref, wmap_ref, bmap_ref, out_ref):
    """Embedding LayerNorm + embedding_hidden_mapping_in dense (E -> H), row-tiled.

    Output is bf16: it is only consumed as the (already bf16-cast) MXU input of
    the first transformer layer, so the f32->bf16 handoff loses nothing extra.
    """
    x = emb_ref[...]                                       # (T, E) f32
    xn = _layer_norm(x, g_ref[...], b_ref[...])            # LN over embedding dim (f32)
    y = jnp.dot(xn.astype(jnp.bfloat16), wmap_ref[...],
                preferred_element_type=jnp.float32) + bmap_ref[...]
    out_ref[...] = y.astype(out_ref.dtype)


def albert_layers_kernel(x_ref,
                         wqkv_ref, bqkv_ref, wo_ref, bo_ref, g1_ref, b1_ref,
                         wf_ref, bf_ref, wfo_ref, bfo_ref, g2_ref, b2_ref,
                         out_ref, h_ref, *, num_heads):
    """All shared ALBERT transformer layers for one batch element.

    Grid = (batch, layer).  h_ref is a persistent (S, H) f32 VMEM scratch that
    carries the hidden state across the layer axis; the shared weights have
    constant index_maps (single-buffered) so they stay resident in VMEM for the
    whole grid.  Only the CLS row of the final hidden state is written out.
    """
    layer = pl.program_id(1)

    @pl.when(layer == 0)
    def _():
        h_ref[...] = x_ref[...].astype(jnp.float32)

    x = h_ref[...]                                         # (S, H) f32
    S, H = x.shape
    hd = H // num_heads
    scale = 1.0 / math.sqrt(hd)

    # --- fused Q/K/V projection: one (S,H) @ (H,3H) bf16 matmul, f32 accum ---
    x_bf = x.astype(jnp.bfloat16)
    qkv = jnp.dot(x_bf, wqkv_ref[...], preferred_element_type=jnp.float32) + bqkv_ref[...]

    # --- multi-head attention, per head (2-D dots only):
    #       * no (S, nh, hd) transposes / (nh, S, S) materialization
    #       * softmax normalization deferred until after the PV matmul
    # attention_mask defaults to all-ones in forward_wrapper -> no additive mask.
    # TODO(synk): on v7x with very long S, process heads in 128-lane groups and
    # tile queries to bound the (S, S) score tile further.
    ctx_parts = []
    for h in range(num_heads):
        lo = h * hd
        qh = (qkv[:, lo:lo + hd] * scale).astype(jnp.bfloat16)       # fold 1/sqrt(hd) into q
        kh = qkv[:, H + lo:H + lo + hd].astype(jnp.bfloat16)
        vh = qkv[:, 2 * H + lo:2 * H + lo + hd].astype(jnp.bfloat16)

        s = lax.dot_general(qh, kh, (((1,), (1,)), ((), ())),
                            preferred_element_type=jnp.float32)      # (S, S) = q @ k^T
        m = jnp.max(s, axis=-1, keepdims=True)
        p = jnp.exp(s - m)                                            # un-normalized probs
        inv = pl.reciprocal(jnp.sum(p, axis=-1, keepdims=True), approx=True)
        ctx_h = jnp.dot(p.astype(jnp.bfloat16), vh,
                        preferred_element_type=jnp.float32) * inv     # (S, hd), deferred norm
        ctx_parts.append(ctx_h.astype(jnp.bfloat16))
    ctx = jnp.concatenate(ctx_parts, axis=-1)                         # (S, H) bf16

    # wo keeps its full-K (H) contraction.
    attn_out = (jnp.dot(ctx, wo_ref[...],
                        preferred_element_type=jnp.float32) + bo_ref[...])
    x1 = _layer_norm(x + attn_out, g1_ref[...], b1_ref[...])

    # --- FFN (full-K matmuls) ---
    # TODO(synk): if VMEM gets tight on v7x at long S, chunk wf/wfo over the
    # intermediate dim with an (S, H) accumulator.
    ff = _gelu_new(jnp.dot(x1.astype(jnp.bfloat16), wf_ref[...],
                           preferred_element_type=jnp.float32) + bf_ref[...])
    ffo = (jnp.dot(ff.astype(jnp.bfloat16), wfo_ref[...],
                   preferred_element_type=jnp.float32) + bfo_ref[...])
    x2 = _layer_norm(ffo + x1, g2_ref[...], b2_ref[...])

    h_ref[...] = x2

    @pl.when(layer == pl.num_programs(1) - 1)
    def _():
        out_ref[...] = x2[0:1, :]          # only the CLS row is consumed downstream


def head_kernel(cls_ref, wp_ref, bp_ref, wc_ref, bc_ref, labels_ref,
                logits_ref, loss_ref):
    """Pooler (dense+tanh on CLS token) + classifier + mean cross-entropy loss."""
    x = cls_ref[...].astype(jnp.bfloat16)                  # (B, H)
    pooled = jnp.tanh(jnp.dot(x, wp_ref[...],
                              preferred_element_type=jnp.float32) + bp_ref[...])
    logits = (jnp.dot(pooled.astype(jnp.bfloat16), wc_ref[...],
                      preferred_element_type=jnp.float32) + bc_ref[...])   # (B, L) f32

    B, L = logits.shape
    m = jnp.max(logits, axis=-1, keepdims=True)
    z = logits - m
    logp = z - jnp.log(jnp.sum(jnp.exp(z), axis=-1, keepdims=True))
    classes = lax.broadcasted_iota(jnp.int32, (B, L), 1)
    onehot = (classes == labels_ref[...]).astype(jnp.float32)          # labels (B, 1)
    # NOTE: on the labels=None path the caller passes dummy zero labels and
    # discards this loss; computing it anyway keeps the kernel single-variant.
    loss = -jnp.sum(onehot * logp) / float(B)

    logits_ref[...] = logits
    loss_ref[0, 0] = loss


# ----------------------------- wrappers calling pallas_call -----------------------------

def _vmem_limit_bytes():
    """Generation-aware scoped-VMEM limit (leave headroom on 64 MiB parts)."""
    cap = 128 * 1024 * 1024
    try:
        info = pltpu.get_tpu_info()
        cap = int(getattr(info, "vmem_capacity_bytes", cap))
    except Exception:
        pass
    if cap <= 64 * 1024 * 1024:          # v7x-class TensorCore
        return 48 * 1024 * 1024
    return 96 * 1024 * 1024              # v5e / v6e (128 MiB physical)


def _row_tile(n):
    for t in (512, 256, 128, 64, 32, 16, 8):
        if n % t == 0:
            return t
    return n


def embed_map(emb, params):
    """LN over embedding dim + E->H dense, gridded over row tiles of B*S. bf16 out."""
    B, S, E = emb.shape
    H = params["w_map"].shape[1]
    R = B * S
    T = _row_tile(R)
    emb2 = emb.reshape(R, E)
    out = pl.pallas_call(
        embed_map_kernel,
        grid=(R // T,),
        in_specs=[
            pl.BlockSpec((T, E), lambda i: (i, 0)),
            pl.BlockSpec((1, E), lambda i: (0, 0)),
            pl.BlockSpec((1, E), lambda i: (0, 0)),
            pl.BlockSpec((E, H), lambda i: (0, 0)),
            pl.BlockSpec((1, H), lambda i: (0, 0)),
        ],
        out_specs=pl.BlockSpec((T, H), lambda i: (i, 0)),
        out_shape=jax.ShapeDtypeStruct((R, H), jnp.bfloat16),   # bf16 handoff to layer stack
        compiler_params=pltpu.CompilerParams(
            dimension_semantics=("parallel",),
            vmem_limit_bytes=_vmem_limit_bytes()),
    )(emb2, params["emb_ln_g"], params["emb_ln_b"],
      params["w_map"].astype(jnp.bfloat16), params["b_map"])
    return out.reshape(B, S, H)


_LAYER_PARAM_NAMES = ("w_qkv", "b_qkv", "wo", "bo", "ln1_g", "ln1_b",
                      "wf", "bf", "wfo", "bfo", "ln2_g", "ln2_b")


def _prep_layer_params(params):
    """Fuse Q/K/V and cast MXU weights to bf16 (biases / LN params stay f32)."""
    return {
        "w_qkv": jnp.concatenate([params["wq"], params["wk"], params["wv"]],
                                 axis=1).astype(jnp.bfloat16),
        "b_qkv": jnp.concatenate([params["bq"], params["bk"], params["bv"]], axis=1),
        "wo": params["wo"].astype(jnp.bfloat16), "bo": params["bo"],
        "ln1_g": params["ln1_g"], "ln1_b": params["ln1_b"],
        "wf": params["wf"].astype(jnp.bfloat16), "bf": params["bf"],
        "wfo": params["wfo"].astype(jnp.bfloat16), "bfo": params["bfo"],
        "ln2_g": params["ln2_g"], "ln2_b": params["ln2_b"],
    }


def albert_layers(x_bf16, layer_params, num_heads, num_layers):
    """All num_layers applications of the shared ALBERT layer in ONE pallas_call.

    Returns only the CLS row of the final hidden state: (B, 1, H) f32.
    """
    B, S, H = x_bf16.shape
    ws = [layer_params[n] for n in _LAYER_PARAM_NAMES]    # all 2-D arrays
    vmem_limit = _vmem_limit_bytes()

    def build(weight_pipeline_mode):
        kw = {} if weight_pipeline_mode is None else dict(pipeline_mode=weight_pipeline_mode)
        # Constant index_map per weight -> block stays resident across the whole grid.
        weight_specs = [pl.BlockSpec(w.shape, lambda b, l: (0, 0), **kw) for w in ws]
        return pl.pallas_call(
            functools.partial(albert_layers_kernel, num_heads=num_heads),
            grid=(B, num_layers),                          # layer axis innermost
            in_specs=[pl.BlockSpec((None, S, H), lambda b, l: (b, 0, 0))] + weight_specs,
            out_specs=pl.BlockSpec((None, 1, H), lambda b, l: (b, 0, 0)),
            out_shape=jax.ShapeDtypeStruct((B, 1, H), jnp.float32),
            scratch_shapes=[pltpu.VMEM((S, H), jnp.float32)],   # persistent hidden state
            compiler_params=pltpu.CompilerParams(
                dimension_semantics=("parallel", "arbitrary"),  # batch across TCs on v7x
                vmem_limit_bytes=vmem_limit),
        )

    try:
        # Single-buffer the resident shared weights (no wasted double buffer).
        return build(pl.Buffered(1))(x_bf16, *ws)
    except Exception:
        # TODO(synk): pl.Buffered(1) rejected by this jax build; fall back to the
        # default double-buffered (still single-DMA) weight pipeline.
        return build(None)(x_bf16, *ws)


def classification_head(cls_hidden, params, labels2d):
    B, H = cls_hidden.shape
    L = params["w_cls"].shape[1]
    logits, loss = pl.pallas_call(
        head_kernel,
        out_shape=(jax.ShapeDtypeStruct((B, L), jnp.float32),
                   jax.ShapeDtypeStruct((1, 1), jnp.float32)),
        in_specs=[pl.BlockSpec(memory_space=pltpu.MemorySpace.VMEM)] * 6,
        out_specs=(pl.BlockSpec(memory_space=pltpu.MemorySpace.VMEM),
                   pl.BlockSpec(memory_space=pltpu.MemorySpace.SMEM)),
    )(cls_hidden, params["w_pool"].astype(jnp.bfloat16), params["b_pool"],
      params["w_cls"].astype(jnp.bfloat16), params["b_cls"], labels2d)
    return logits, loss[0, 0]


def albert_sequence_forward(params, cfg, input_ids, labels=None):
    """Mirrors forward_wrapper(AlbertForSequenceClassification, text, labels)."""
    B, S = input_ids.shape
    # --- embeddings (gathers = glue in plain JAX) ---
    word = params["word_emb"][input_ids]                        # (B, S, E)
    pos = params["pos_emb"][:S][None, :, :]                     # (1, S, E)
    tok = params["tok_emb"][0][None, None, :]                   # (1, 1, E)  (token_type_ids = 0)
    emb = word + pos + tok
    h = embed_map(emb, params)                                  # LN + E->H projection (Pallas, bf16)

    # --- shared ALBERT transformer layer x num_layers: single Pallas call ---
    layer_params = _prep_layer_params(params)
    h_cls = albert_layers(h, layer_params, cfg["num_heads"], cfg["num_layers"])  # (B, 1, H)

    # --- pooler / classifier / loss (Pallas) ---
    pooled_in = h_cls[:, 0, :]                                  # CLS token, (B, H)
    if labels is None:
        dummy = jnp.zeros((B, 1), jnp.int32)
        logits, _ = classification_head(pooled_in, params, dummy)
        return (logits,)                                        # logits (HF "probs" naming)
    labels2d = labels.reshape(B, 1).astype(jnp.int32)
    logits, loss = classification_head(pooled_in, params, labels2d)
    return (loss, logits)


# ----------------------------- deterministic parameter init -----------------------------

def init_params(cfg, key):
    E, H, I, L = cfg["embed_size"], cfg["hidden"], cfg["intermediate"], cfg["num_labels"]
    V, P = cfg["vocab"], cfg["max_pos"]

    keys = iter(jax.random.split(key, 32))

    def w(shape, scale=0.02):
        return (scale * jax.random.normal(next(keys), shape)).astype(jnp.float32)

    p = {
        # embeddings
        "word_emb": w((V, E)),
        "pos_emb": w((P, E)),
        "tok_emb": w((2, E)),
        "emb_ln_g": jnp.ones((1, E), jnp.float32),
        "emb_ln_b": jnp.zeros((1, E), jnp.float32),
        "w_map": w((E, H)), "b_map": jnp.zeros((1, H), jnp.float32),
        # shared transformer layer
        "wq": w((H, H)), "bq": jnp.zeros((1, H), jnp.float32),
        "wk": w((H, H)), "bk": jnp.zeros((1, H), jnp.float32),
        "wv": w((H, H)), "bv": jnp.zeros((1, H), jnp.float32),
        "wo": w((H, H)), "bo": jnp.zeros((1, H), jnp.float32),
        "ln1_g": jnp.ones((1, H), jnp.float32), "ln1_b": jnp.zeros((1, H), jnp.float32),
        "wf": w((H, I)), "bf": jnp.zeros((1, I), jnp.float32),
        "wfo": w((I, H)), "bfo": jnp.zeros((1, H), jnp.float32),
        "ln2_g": jnp.ones((1, H), jnp.float32), "ln2_b": jnp.zeros((1, H), jnp.float32),
        # pooler + classifier
        "w_pool": w((H, H)), "b_pool": jnp.zeros((1, H), jnp.float32),
        "w_cls": w((H, L)), "b_cls": jnp.zeros((1, L), jnp.float32),
    }
    return p


# ----------------------------- main -----------------------------

if __name__ == "__main__":
    # TODO(synk): pretrained 'albert-base-v2' checkpoint loading has no in-script
    # equivalent; weights are synthetic and shapes are scaled down.
    cfg = dict(vocab=100, embed_size=16, hidden=32, num_heads=2, intermediate=64,
               num_layers=2, max_pos=8, num_labels=2)
    B, S = 2, 8

    key = jax.random.PRNGKey(0)
    k_param, k_ids, k_lab = jax.random.split(key, 3)

    params = init_params(cfg, k_param)
    input_ids = jax.random.randint(k_ids, (B, S), 0, cfg["vocab"], dtype=jnp.int32)
    labels = jax.random.randint(k_lab, (B,), 0, cfg["num_labels"], dtype=jnp.int32)

    loss, logits = albert_sequence_forward(params, cfg, input_ids, labels)
    loss = jax.block_until_ready(loss)
    logits = jax.block_until_ready(logits)

    logits_only = albert_sequence_forward(params, cfg, input_ids, None)[0]
    jax.block_until_ready(logits_only)

    print("KERNEL_OK")
</pallas_src>

<mosaic_0001>
module attributes {stable_mosaic.version = 11 : i64} {
  func.func @embed_map_kernel(%arg0: i32, %arg1: memref<16x16xf32, #tpu.memory_space<vmem>>, %arg2: memref<1x16xf32, #tpu.memory_space<vmem>>, %arg3: memref<1x16xf32, #tpu.memory_space<vmem>>, %arg4: memref<16x32xbf16, #tpu.memory_space<vmem>>, %arg5: memref<1x32xf32, #tpu.memory_space<vmem>>, %arg6: memref<16x32xbf16, #tpu.memory_space<vmem>>) attributes {dimension_semantics = [#tpu.dimension_semantics<parallel>], iteration_bounds = array<i64: 1>, scalar_prefetch = 0 : i64, scratch_operands = 0 : i64, tpu.core_type = #tpu.core_type<tc>, window_params = [{transform_indices = @transform_0, window_bounds = array<i64: 16, 16>}, {pipeline_mode = #tpu.pipeline_mode<synchronous>, transform_indices = @transform_1, window_bounds = array<i64: 1, 16>}, {pipeline_mode = #tpu.pipeline_mode<synchronous>, transform_indices = @transform_2, window_bounds = array<i64: 1, 16>}, {pipeline_mode = #tpu.pipeline_mode<synchronous>, transform_indices = @transform_3, window_bounds = array<i64: 16, 32>}, {pipeline_mode = #tpu.pipeline_mode<synchronous>, transform_indices = @transform_4, window_bounds = array<i64: 1, 32>}, {transform_indices = @transform_5, window_bounds = array<i64: 16, 32>}]} {
    %c0 = arith.constant 0 : index
    %c0_0 = arith.constant 0 : index
    %0 = vector.load %arg1[%c0, %c0_0] : memref<16x16xf32, #tpu.memory_space<vmem>>, vector<16x16xf32>
    %c0_1 = arith.constant 0 : index
    %c0_2 = arith.constant 0 : index
    %1 = vector.load %arg2[%c0_1, %c0_2] : memref<1x16xf32, #tpu.memory_space<vmem>>, vector<1x16xf32>
    %c0_3 = arith.constant 0 : index
    %c0_4 = arith.constant 0 : index
    %2 = vector.load %arg3[%c0_3, %c0_4] : memref<1x16xf32, #tpu.memory_space<vmem>>, vector<1x16xf32>
    %cst = arith.constant dense<0.000000e+00> : vector<16xf32>
    %3 = vector.multi_reduction <add>, %0, %cst [1] : vector<16x16xf32> to vector<16xf32>
    %4 = vector.shape_cast %3 : vector<16xf32> to vector<16x1xf32>
    %cst_5 = arith.constant 1.600000e+01 : f32
    %5 = vector.broadcast %cst_5 : f32 to vector<16x1xf32>
    %6 = arith.divf %4, %5 : vector<16x1xf32>
    %7 = vector.broadcast %6 : vector<16x1xf32> to vector<16x16xf32>
    %8 = arith.subf %0, %7 : vector<16x16xf32>
    %9 = arith.mulf %8, %8 : vector<16x16xf32>
    %cst_6 = arith.constant dense<0.000000e+00> : vector<16xf32>
    %10 = vector.multi_reduction <add>, %9, %cst_6 [1] : vector<16x16xf32> to vector<16xf32>
    %11 = vector.shape_cast %10 : vector<16xf32> to vector<16x1xf32>
    %cst_7 = arith.constant 1.600000e+01 : f32
    %12 = vector.broadcast %cst_7 : f32 to vector<16x1xf32>
    %13 = arith.divf %11, %12 : vector<16x1xf32>
    %14 = vector.broadcast %6 : vector<16x1xf32> to vector<16x16xf32>
    %15 = arith.subf %0, %14 : vector<16x16xf32>
    %cst_8 = arith.constant 9.99999996E-13 : f32
    %16 = vector.broadcast %cst_8 : f32 to vector<16x1xf32>
    %17 = arith.addf %13, %16 : vector<16x1xf32>
    %18 = math.rsqrt %17 : vector<16x1xf32>
    %19 = vector.broadcast %18 : vector<16x1xf32> to vector<16x16xf32>
    %20 = arith.mulf %15, %19 : vector<16x16xf32>
    %21 = vector.broadcast %1 : vector<1x16xf32> to vector<16x16xf32>
    %22 = arith.mulf %20, %21 : vector<16x16xf32>
    %23 = vector.broadcast %2 : vector<1x16xf32> to vector<16x16xf32>
    %24 = arith.addf %22, %23 : vector<16x16xf32>
    %25 = arith.truncf %24 : vector<16x16xf32> to vector<16x16xbf16>
    %c0_9 = arith.constant 0 : index
    %c0_10 = arith.constant 0 : index
    %26 = vector.load %arg4[%c0_9, %c0_10] : memref<16x32xbf16, #tpu.memory_space<vmem>>, vector<16x32xbf16>
    %cst_11 = arith.constant dense<0.000000e+00> : vector<16x32xf32>
    %27 = tpu.matmul %25, %26, %cst_11 {dimension_numbers = #tpu.dot_dimension_numbers<[1], [0], [0], [1], [0, 0, 1, 1], [], []>} : vector<16x16xbf16>, vector<16x32xbf16>, vector<16x32xf32> -> vector<16x32xf32>
    %c0_12 = arith.constant 0 : index
    %c0_13 = arith.constant 0 : index
    %28 = vector.load %arg5[%c0_12, %c0_13] : memref<1x32xf32, #tpu.memory_space<vmem>>, vector<1x32xf32>
    %29 = vector.broadcast %28 : vector<1x32xf32> to vector<16x32xf32>
    %30 = arith.addf %27, %29 : vector<16x32xf32>
    %31 = arith.truncf %30 : vector<16x32xf32> to vector<16x32xbf16>
    %c0_14 = arith.constant 0 : index
    %c0_15 = arith.constant 0 : index
    %32 = vector.load %arg6[%c0_14, %c0_15] : memref<16x32xbf16, #tpu.memory_space<vmem>>, vector<16x32xbf16>
    tpu.vector_store %arg6[%c0_14, %c0_15], %31 {strides = array<i32>} : memref<16x32xbf16, #tpu.memory_space<vmem>>, vector<16x32xbf16>,
    return
  }
  func.func @transform_0(%arg0: i32) -> (i32, i32) {
    %c0_i32 = arith.constant 0 : i32
    %c0_i32_0 = arith.constant 0 : i32
    return %arg0, %c0_i32 : i32, i32
  }
  func.func @transform_1(%arg0: i32) -> (i32, i32) {
    %c0_i32 = arith.constant 0 : i32
    %c0_i32_0 = arith.constant 0 : i32
    %c0_i32_1 = arith.constant 0 : i32
    return %c0_i32, %c0_i32_0 : i32, i32
  }
  func.func @transform_2(%arg0: i32) -> (i32, i32) {
    %c0_i32 = arith.constant 0 : i32
    %c0_i32_0 = arith.constant 0 : i32
    %c0_i32_1 = arith.constant 0 : i32
    return %c0_i32, %c0_i32_0 : i32, i32
  }
  func.func @transform_3(%arg0: i32) -> (i32, i32) {
    %c0_i32 = arith.constant 0 : i32
    %c0_i32_0 = arith.constant 0 : i32
    %c0_i32_1 = arith.constant 0 : i32
    return %c0_i32, %c0_i32_0 : i32, i32
  }
  func.func @transform_4(%arg0: i32) -> (i32, i32) {
    %c0_i32 = arith.constant 0 : i32
    %c0_i32_0 = arith.constant 0 : i32
    %c0_i32_1 = arith.constant 0 : i32
    return %c0_i32, %c0_i32_0 : i32, i32
  }
  func.func @transform_5(%arg0: i32) -> (i32, i32) {
    %c0_i32 = arith.constant 0 : i32
    %c0_i32_0 = arith.constant 0 : i32
    return %arg0, %c0_i32 : i32, i32
  }
}

</mosaic_0001>

<bundles_post_ra>
// kernel: tpu_custom_call.1
= control target key start
LH: loop header
LB: loop body
LE: loop exit
PB: predicated region body
PF: predicated region fallthrough
CT: control target
= control target key end

     0   :  { %10 = vsyncpa [#allocation3], 0  ;;  %s528_s0 = inlined_call_operand.hbm [shape: f32[16,16], index: 0, kind: input, shape index: {}]   ;;  %s529_s1 = inlined_call_operand.hbm [shape: f32[1,16], index: 1, kind: input, shape index: {}]   ;;  %s530_s2 = inlined_call_operand.hbm [shape: f32[1,16], index: 2, kind: input, shape index: {}]   ;;  %s531_s3 = inlined_call_operand.hbm [shape: bf16[16,32], index: 3, kind: input, shape index: {}]   ;;  %s532_s4 = inlined_call_operand.hbm [shape: f32[1,32], index: 4, kind: input, shape index: {}]   ;;  %s533_s5 = inlined_call_operand.hbm [shape: bf16[16,32], index: 5, kind: output, shape index: {}]  }
   0x1   :  { %11 = vsyncpa [#allocation6], 0 }
   0x2   :  { %12 = vsyncpa [#allocation9], 0 }
   0x3   :  { %13 = vsyncpa [#allocation4], 0  ;;  %s396_s18 = smov [#allocation5]   ;;  %s397_s20 = smov [#allocation8]  }
   0x4   :  { %s32_s19 = sshll.u32 %s396_s18, 4  ;;  %s51_s21 = sshll.u32 %s397_s20, 4  ;;  %s33_s19 = int_to_ptr.vmem [resolvable:$true] %s32_s19  ;;  %s438_s21 = int_to_ptr.vmem [resolvable:$true] %s51_s21 }
   0x5   :  { %s256_s24 = scalar_lea.hbm %s529_s1, 16 }
   0x6   :  { %p257_p0 = scmp.ne.s32.totalorder %s529_s1, %s256_s24  ;;  %p260_p1 = scmp.lt.u32.totalorder %s256_s24, %s529_s1 }
   0x8   :  { %p262_p2 = pnand %p260_p1, %p257_p0 }
   0xa   :  { %265 = shalt.err (!%p262_p2)
}
   0xb   :  { %s266_s29 = scalar_lea.vmem %s33_s19, 16  ;;  %s270_s30 = scalar_lea.vmem %s33_s19, 32 }
   0xc   :  { %p267_p3 = scmp.ne.s32.totalorder %s33_s19, %s266_s29  ;;  %p271_p4 = scmp.lt.s32.totalorder %s33_s19, %s33_s19 }
   0xd   :  { %p272_p5 = scmp.lt.s32.totalorder %s270_s30, %s266_s29 }
   0xf   :  { %p273_p6 = por %p272_p5, %p271_p4 }
  0x11   :  { %p274_p7 = pnand %p273_p6, %p267_p3 }
  0x13   :  { %277 = shalt.err (!%p274_p7)
}
  0x14   :  { %35 = dma.hbm_to_vmem [thread:$0]  %s529_s1, 16, %s33_s19, [#allocation6]  }
  0x15   :  { %s278_s10 = scalar_lea.hbm %s531_s3, 128 }
  0x16   :  { %p279_p8 = scmp.ne.s32.totalorder %s531_s3, %s278_s10  ;;  %p282_p9 = scmp.lt.u32.totalorder %s278_s10, %s531_s3 }
  0x18   :  { %p284_p10 = pnand %p282_p9, %p279_p8 }
  0x1a   :  { %287 = shalt.err (!%p284_p10)
}
  0x1b   :  { %s288_s15 = scalar_lea.vmem %s438_s21, 128  ;;  %p293_p12 = scmp.lt.s32.totalorder %s438_s21, %s438_s21 }
  0x1c   :  { %p289_p11 = scmp.ne.s32.totalorder %s438_s21, %s288_s15  ;;  %p294_p13 = scmp.lt.s32.totalorder %s288_s15, %s288_s15 }
  0x1e   :  { %p295_p0 = por %p294_p13, %p293_p12 }
  0x20   :  { %p296_p1 = pnand %p295_p0, %p289_p11 }
  0x22   :  { %299 = shalt.err (!%p296_p1)
}
  0x23   :  { %s398_s1 = smov 64   ;;  %s399_s16 = smov 4  }
  0x24   :  { %57 = dma.hbm_to_vmem [thread:$0]  %s531_s3, 128, %s438_s21, [#allocation9], %s398_s1, %s398_s1, %s399_s16  }
  0x25   :  { %s400_s19 = smov [#allocation2]   ;;  %s300_s24 = scalar_lea.hbm %s528_s0, 256 }
  0x26   :  { %s19_s20 = sshll.u32 %s400_s19, 4  ;;  %p301_p2 = scmp.ne.s32.totalorder %s528_s0, %s300_s24  ;;  %s20_s20 = int_to_ptr.vmem [resolvable:$true] %s19_s20 }
  0x27   :  { %p304_p3 = scmp.lt.u32.totalorder %s300_s24, %s528_s0 }
  0x29   :  { %p306_p4 = pnand %p304_p3, %p301_p2 }
  0x2b   :  { %309 = shalt.err (!%p306_p4)
}
  0x2c   :  { %s310_s29 = scalar_lea.vmem %s20_s20, 256  ;;  %p315_p6 = scmp.lt.s32.totalorder %s20_s20, %s20_s20 }
  0x2d   :  { %p311_p5 = scmp.ne.s32.totalorder %s20_s20, %s310_s29  ;;  %p316_p7 = scmp.lt.s32.totalorder %s310_s29, %s310_s29 }
  0x2f   :  { %p317_p8 = por %p316_p7, %p315_p6 }
  0x31   :  { %p318_p9 = pnand %p317_p8, %p311_p5 }
  0x33   :  { %321 = shalt.err (!%p318_p9)
}
  0x34   :  { %s401_s3 = smov 128   ;;  %s402_s21 = smov 8  }
  0x35   :  { %25 = dma.hbm_to_vmem [thread:$0]  %s528_s0, 256, %s20_s20, [#allocation3], %s401_s3, %s401_s3, %s402_s21  }
  0x36   :  { %s403_s7 = smov [#allocation7]   ;;  %s404_s9 = smov [#allocation10]  }
  0x37   :  { %s42_s8 = sshll.u32 %s403_s7, 4  ;;  %s64_s10 = sshll.u32 %s404_s9, 4  ;;  %s43_s8 = int_to_ptr.vmem [resolvable:$true] %s42_s8  ;;  %s65_s10 = int_to_ptr.vmem [resolvable:$true] %s64_s10 }
  0x38   :  { %s322_s13 = scalar_lea.hbm %s530_s2, 16 }
  0x39   :  { %p323_p10 = scmp.ne.s32.totalorder %s530_s2, %s322_s13  ;;  %p326_p11 = scmp.lt.u32.totalorder %s322_s13, %s530_s2 }
  0x3b   :  { %p328_p12 = pnand %p326_p11, %p323_p10 }
  0x3d   :  { %331 = shalt.err (!%p328_p12)
}
  0x3e   :  { %s332_s0 = scalar_lea.vmem %s43_s8, 16  ;;  %s336_s19 = scalar_lea.vmem %s43_s8, 32 }
  0x3f   :  { %p333_p13 = scmp.ne.s32.totalorder %s43_s8, %s332_s0  ;;  %p337_p0 = scmp.lt.s32.totalorder %s43_s8, %s43_s8 }
  0x40   :  { %p338_p1 = scmp.lt.s32.totalorder %s336_s19, %s332_s0 }
  0x42   :  { %p339_p2 = por %p338_p1, %p337_p0 }
  0x44   :  { %p340_p3 = pnand %p339_p2, %p333_p13 }
  0x46   :  { %343 = shalt.err (!%p340_p3)
}
  0x47   :  { %45 = dma.hbm_to_vmem [thread:$0]  %s530_s2, 16, %s43_s8, [#allocation6]  }
  0x48   :  { %s344_s25 = scalar_lea.hbm %s532_s4, 16 }
  0x49   :  { %p345_p4 = scmp.ne.s32.totalorder %s532_s4, %s344_s25  ;;  %p348_p5 = scmp.lt.u32.totalorder %s344_s25, %s532_s4 }
  0x4b   :  { %p350_p6 = pnand %p348_p5, %p345_p4 }
  0x4d   :  { %353 = shalt.err (!%p350_p6)
}
  0x4e   :  { %s354_s3 = scalar_lea.vmem %s65_s10, 16  ;;  %s358_s21 = scalar_lea.vmem %s65_s10, 32 }
  0x4f   :  { %p355_p7 = scmp.ne.s32.totalorder %s65_s10, %s354_s3  ;;  %p359_p8 = scmp.lt.s32.totalorder %s65_s10, %s65_s10 }
  0x50   :  { %p360_p9 = scmp.lt.s32.totalorder %s358_s21, %s354_s3 }
  0x52   :  { %p361_p10 = por %p360_p9, %p359_p8 }
  0x54   :  { %p362_p11 = pnand %p361_p10, %p355_p7 }
  0x56   :  { %365 = shalt.err (!%p362_p11)
}
  0x57   :  { %67 = dma.hbm_to_vmem [thread:$0]  %s532_s4, 16, %s65_s10, [#allocation9]  }
  0x58   :  { %388 = dma.done.wait [#allocation3], 256  }
  0x59   :  { %389 = vsyncadd [#allocation3], 4294967040 }
  0x5a   :  { %390 = dma.done.wait [#allocation6], 32  }
  0x5b   :  { %391 = vsyncadd [#allocation6], 4294967264 }
  0x5c   :  { %392 = dma.done.wait [#allocation9], 144  }
  0x5d   :  { %393 = vsyncadd [#allocation9], 4294967152  ;;  %vm88_vm0 = vcmask 130048   ;;  %v84_v0 = vld [vmem:[#allocation2] sm:$0xff]  ;;  %v85_v1 = vld [vmem:[#allocation2 + $0x8] sm:$0xff]  ;;  %v405_v15 = vmov 0.0  }
  0x5e   :  { %v89_v2 = vsel %vm88_vm0, %v84_v0, 0.0  ;;  %v92_v3 = vsel %vm88_vm0, %v85_v1, 0.0  ;;  %v251_v14 = vld [vmem:[#allocation8] sm:$0xff]   ;;  %233 = vmatprep.subr.bf16.mxu0 %v405_v15  ;;  %vm406_vm1 = vmmov 0   ;;  %v222_v24 = vld [vmem:[#allocation5] ss:$0 sm:$0xff] }
  0x5f   :  { %90 = vadd.xlane.f32.xlu0 %v89_v2  ;;  %235 = vmatprep.mubr.msk.bf16.mxu0 %vm406_vm1, %v405_v15  ;;  %v223_v28 = vld [vmem:[#allocation7] ss:$0 sm:$0xff]  ;;  %v224_v33 = vld [vmem:[#allocation10] ss:$0 sm:$0xff]  ;;  %vm200_vm2 = vcmask 257024   ;;  %s407_s4 = smov [#allocation11]  }
  0x60   :  { %234 = vmatpush3.bf16.msra.mxu0 %v251_v14  ;;  %s208_s6 = sshll.u32 %s407_s4, 4  ;;  %s209_s6 = int_to_ptr.vmem [resolvable:$true] %s208_s6 }
  0x61   :  { %s366_s7 = scalar_lea.vmem %s209_s6, 128  ;;  %p371_p13 = scmp.lt.s32.totalorder %s209_s6, %s209_s6 }
  0x62   :  { %p367_p12 = scmp.ne.s32.totalorder %s209_s6, %s366_s7  ;;  %p372_p0 = scmp.lt.s32.totalorder %s366_s7, %s366_s7 }
  0x63   :  { %93 = vadd.xlane.f32.xlu0 %v92_v3 }
  0x64   :  { %p373_p1 = por %p372_p0, %p371_p13 }
  0x66   :  { %p374_p2 = pnand %p373_p1, %p367_p12 }
  0xec   :  { %v91_v4 = vpop.xlane.xlu0 %90 }
  0xed   :  { %v96_v5 = vmul.f32 0.0625, %v91_v4 }
  0xef   :  { %v98_v6 = vsub.f32 %v84_v0, %v96_v5 }
  0xf0   :  { %v94_v7 = vpop.xlane.xlu0 %93 }
  0xf1   :  { %v97_v8 = vmul.f32 0.0625, %v94_v7  ;;  %v100_v9 = vmul.f32 %v98_v6, %v98_v6 }
  0xf3   :  { %v99_v10 = vsub.f32 %v85_v1, %v97_v8  ;;  %v102_v11 = vsel %vm88_vm0, %v100_v9, 0.0 }
  0xf4   :  { %103 = vadd.xlane.f32.xlu1 %v102_v11 }
  0xf5   :  { %v101_v12 = vmul.f32 %v99_v10, %v99_v10 }
  0xf7   :  { %v105_v13 = vsel %vm88_vm0, %v101_v12, 0.0 }
  0xf8   :  { %106 = vadd.xlane.f32.xlu1 %v105_v13 }
 0x181   :  { %v104_v16 = vpop.xlane.xlu1 %103 }
 0x182   :  { %v108_v17 = vmul.f32 0.0625, %v104_v16 }
 0x184   :  { %v110_v18 = vadd.f32 1e-12, %v108_v17 }
 0x185   :  { %v107_v19 = vpop.xlane.xlu1 %106 }
 0x186   :  { %252 = vrsqrt.f32 %v110_v18  ;;  %v109_v20 = vmul.f32 0.0625, %v107_v19 }
 0x188   :  { %v111_v21 = vadd.f32 1e-12, %v109_v20 }
 0x18a   :  { %254 = vrsqrt.f32 %v111_v21 }
 0x190   :  { %v253_v22 = vpop.eup %252 }
 0x191   :  { %v114_v23 = vmul.f32 %v253_v22, %v98_v6 }
 0x193   :  { %v122_v27 = vmul.f32 %v222_v24, %v114_v23 }
 0x194   :  { %v255_v25 = vpop.eup %254 }
 0x195   :  { %v115_v26 = vmul.f32 %v255_v25, %v99_v10  ;;  %v130_v30 = vadd.f32 %v223_v28, %v122_v27 }
 0x197   :  { %v123_v29 = vmul.f32 %v222_v24, %v115_v26 }
 0x199   :  { %v131_v31 = vadd.f32 %v223_v28, %v123_v29 }
 0x19b   :  { %v132_v32 = vpack.c.bf16 %v131_v31, %v130_v30 }
 0x19d   :  { %236 = vmatmul.mubr.msk.bf16.vlgmr.msra.gmra.mrb[0].mxu0 %vm88_vm0, %v132_v32 }
 0x270   :  { %v185_v34 = vpop.f32.mrb[0].mxu0 }
 0x271   :  { %v186_v35 = vadd.f32 %v224_v33, %v185_v34  ;;  %v237_v36 = vpop.f32.mrb[1].mxu0 }
 0x272   :  { %v188_v37 = vpop.f32.mrb[2].mxu0 }
 0x273   :  { %v229_v38 = vpack.c.bf16 %v186_v35, %v186_v35  ;;  %v189_v39 = vadd.f32 %v224_v33, %v188_v37  ;;  %v238_v40 = vpop.f32.mrb[3].mxu0 }
 0x275   :  { %v230_v41 = vpack.c.bf16 %v189_v39, %v189_v39  ;;  %201 = vst.msk [vmem:[#allocation11] sm:$0xf] %vm200_vm2, %v229_v38 }
 0x277   :  { %202 = vst.msk [vmem:[#allocation11 + $0x4] sm:$0xf] %vm200_vm2, %v230_v41 }
 0x278   :  { %377 = shalt.err (!%p374_p2)
}
 0x279   :  { %s378_s10 = scalar_lea.hbm %s533_s5, 128 }
 0x27a   :  { %p379_p3 = scmp.ne.s32.totalorder %s533_s5, %s378_s10  ;;  %p382_p4 = scmp.lt.u32.totalorder %s378_s10, %s533_s5 }
 0x27c   :  { %p384_p5 = pnand %p382_p4, %p379_p3 }
 0x27e   :  { %387 = shalt.err (!%p384_p5)
}
 0x27f   :  { %214 = dma.vmem_to_hbm [thread:$0]  %s209_s6, 128, %s533_s5, [#allocation4], %s398_s1, %s398_s1, %s399_s16  }
 0x280   :  { %394 = dma.done.wait [#allocation4], 128  }
 0x281   :  { %395 = vsyncadd [#allocation4], 4294967168 }
 0x282   :  { %218 = vsyncpa [#allocation3], 1 }
 0x283   :  { %219 = vsyncpa [#allocation6], 1 }
 0x284   :  { %220 = vsyncpa [#allocation9], 1 }
 0x285   :  { %221 = vsyncpa [#allocation4], 1 }

</bundles_post_ra>
